<compile_context>
chip_gen: v7x
topology: tpu7x:2x2x1
jax: 0.10.0
libtpu: 0.0.40
codegen_flags: <defaults>
</compile_context>

<pallas_src>
import numpy as np

import jax
import jax.numpy as jnp
from jax.experimental import pallas as pl
from jax.experimental.pallas import tpu as pltpu

SQRT2 = 2.0 ** 0.5
SQRT3 = 3.0 ** 0.5
OUT_PAD = 128  # lane-dense padded output width (real outputs live in columns 0..8)


def _round_up(x: int, m: int) -> int:
    return (x + m - 1) // m * m


def _combination_matrix() -> jnp.ndarray:
    """C[k, j]: coefficient of latent k in flattened-3x3 output column j.

    Latents: k=0 -> y0 = x0 @ w0 + b0 ; k=1..5 -> l2[c] = (x2_c @ w2) / sqrt(2).
    Output columns (row-major): [A00 A01 A02 A10 A11 A12 A20 A21 A22].
    """
    s = 1.0 / np.sqrt(3.0)                     # note sqrt(3)/3 == 1/sqrt(3)
    C = np.zeros((6, 9), np.float32)
    C[0, 0] = C[0, 4] = C[0, 8] = -s           # -y0/sqrt(3) on the diagonal
    C[1, 1] = C[1, 3] = 1.0                    # l2[0] -> A01, A10
    C[2, 5] = C[2, 7] = 1.0                    # l2[1] -> A12, A21
    C[3, 0] = C[3, 4] = -s                     # l2[2] -> A00, A11
    C[3, 8] = 2.0 * s                          # l2[2] -> A22
    C[4, 2] = C[4, 6] = 1.0                    # l2[3] -> A02, A20
    C[5, 0] = 1.0
    C[5, 4] = -1.0                             # l2[4] -> A00, -A11
    return jnp.asarray(C)


def _polarizability_kernel(x_ref, w_ref, b_ref, out_ref):
    # One lane-dense MXU matmul per row-tile; bias broadcast-add on the VPU.
    out_ref[...] = (
        jnp.dot(x_ref[...], w_ref[...], preferred_element_type=jnp.float32)
        + b_ref[...]
    )


def polarizability_forward(x0, x2, w0, b0, w2, *, row_tile: int = 1024):
    """x0: (N, F0), x2: (5, N, F2), w0: (F0, 1), b0: (1, 1), w2: (F2, 1)."""
    n, f0 = x0.shape
    f2 = x2.shape[2]
    k = f0 + 5 * f2
    k_pad = _round_up(k, 128)

    # --- combined descriptor:  X = [x0 | x2_c0 | x2_c1 | ... | x2_c4]  (N, K) ------
    x2_nm = jnp.transpose(x2, (1, 0, 2)).reshape(n, 5 * f2)
    x_all = jnp.concatenate([x0.astype(jnp.float32),
                             x2_nm.astype(jnp.float32)], axis=-1)

    # row tiling: tn multiple of 8, N padded up to a multiple of tn
    tn = min(row_tile, _round_up(n, 8))
    n_pad = _round_up(n, tn)
    x_all = jnp.pad(x_all, ((0, n_pad - n), (0, k_pad - k)))

    # --- combined affine map (wrapper-side, tiny):  out = X @ W + b ----------------
    C = _combination_matrix()                                    # (6, 9)
    w0f = w0.astype(jnp.float32)
    w2f = w2.astype(jnp.float32) / SQRT2                         # fold the 1/sqrt(2)
    blocks = [w0f[:, 0:1] * C[0:1, :]]                           # (F0, 9)
    for c in range(5):
        blocks.append(w2f[:, 0:1] * C[c + 1:c + 2, :])           # (F2, 9) each
    w9 = jnp.concatenate(blocks, axis=0)                         # (K, 9)
    w_comb = jnp.zeros((k_pad, OUT_PAD), jnp.float32).at[:k, :9].set(w9)
    b_row = jnp.zeros((1, OUT_PAD), jnp.float32).at[0, :9].set(
        b0.astype(jnp.float32)[0, 0] * C[0, :])

    out = pl.pallas_call(
        _polarizability_kernel,
        out_shape=jax.ShapeDtypeStruct((n_pad, OUT_PAD), jnp.float32),
        grid=(n_pad // tn,),
        in_specs=[
            pl.BlockSpec((tn, k_pad), lambda i: (i, 0)),          # descriptor rows
            pl.BlockSpec((k_pad, OUT_PAD), lambda i: (0, 0)),     # weights: VMEM-resident
            pl.BlockSpec((1, OUT_PAD), lambda i: (0, 0)),         # bias row
        ],
        out_specs=pl.BlockSpec((tn, OUT_PAD), lambda i: (i, 0)),
        compiler_params=pltpu.CompilerParams(
            dimension_semantics=("parallel",),
            vmem_limit_bytes=48 * 1024 * 1024,
        ),
    )(x_all, w_comb, b_row)

    # TensorMap-like values: (n_systems, xyz_1=3, xyz_2=3, properties=1)
    return out[:n, :9].reshape(n, 3, 3, 1)


def _reference(x0, x2, w0, b0, w2):
    """Pure-JAX reference of the same math (mirrors the torch code)."""
    n = x0.shape[0]
    y0 = x0 @ w0 + b0[0]                               # (N, 1)
    y2 = jnp.einsum("cnf,f->nc", x2, w2[:, 0])         # (N, 5)
    l2 = y2 / SQRT2
    A = jnp.zeros((n, 3, 3), jnp.float32)
    A = A.at[:, 0, 0].set(-(SQRT3 * l2[:, 2]) / 3.0 + l2[:, 4])
    A = A.at[:, 1, 1].set(-(SQRT3 * l2[:, 2]) / 3.0 - l2[:, 4])
    A = A.at[:, 2, 2].set(2.0 * SQRT3 * l2[:, 2] / 3.0)
    A = A.at[:, 0, 1].set(l2[:, 0])
    A = A.at[:, 1, 0].set(l2[:, 0])
    A = A.at[:, 1, 2].set(l2[:, 1])
    A = A.at[:, 2, 1].set(l2[:, 1])
    A = A.at[:, 0, 2].set(l2[:, 3])
    A = A.at[:, 2, 0].set(l2[:, 3])
    A = A + (-y0[:, 0] / SQRT3)[:, None, None] * jnp.eye(3, dtype=jnp.float32)
    return A[..., None]


if __name__ == "__main__":
    # Small synthetic shapes: 8 systems, 128 invariant features, 256 l=2 features.
    n_sys, f0, f2 = 8, 128, 256
    key = jax.random.PRNGKey(0)
    k0, k1, k2, k3, k4 = jax.random.split(key, 5)

    x0 = jax.random.normal(k0, (n_sys, f0), dtype=jnp.float32)
    x2 = jax.random.normal(k1, (5, n_sys, f2), dtype=jnp.float32)
    # Deterministic "fitted" linear-model parameters (EquivariantLinear shapes).
    w0 = jax.random.normal(k2, (f0, 1), dtype=jnp.float32) * 0.05
    b0 = jax.random.normal(k3, (1, 1), dtype=jnp.float32) * 0.1
    w2 = jax.random.normal(k4, (f2, 1), dtype=jnp.float32) * 0.05

    pred = jax.block_until_ready(polarizability_forward(x0, x2, w0, b0, w2))
    ref = _reference(x0, x2, w0, b0, w2)
    assert pred.shape == (n_sys, 3, 3, 1)
    assert jnp.allclose(pred, ref, rtol=2e-4, atol=2e-5), "mismatch vs reference"

    # Second check: non-tile-aligned N with a multi-step 'parallel' grid (padding path).
    n_big = 300
    kb0, kb1 = jax.random.split(jax.random.PRNGKey(1), 2)
    x0b = jax.random.normal(kb0, (n_big, f0), dtype=jnp.float32)
    x2b = jax.random.normal(kb1, (5, n_big, f2), dtype=jnp.float32)
    pred_b = jax.block_until_ready(
        polarizability_forward(x0b, x2b, w0, b0, w2, row_tile=128))
    ref_b = _reference(x0b, x2b, w0, b0, w2)
    assert pred_b.shape == (n_big, 3, 3, 1)
    assert jnp.allclose(pred_b, ref_b, rtol=2e-4, atol=2e-5), "mismatch (tiled) vs reference"

    print("KERNEL_OK")
</pallas_src>

<mosaic_0001>
module attributes {stable_mosaic.version = 11 : i64} {
  func.func @_polarizability_kernel(%arg0: i32, %arg1: memref<8x1408xf32, #tpu.memory_space<vmem>>, %arg2: memref<1408x128xf32, #tpu.memory_space<vmem>>, %arg3: memref<1x128xf32, #tpu.memory_space<vmem>>, %arg4: memref<8x128xf32, #tpu.memory_space<vmem>>) attributes {dimension_semantics = [#tpu.dimension_semantics<parallel>], iteration_bounds = array<i64: 1>, scalar_prefetch = 0 : i64, scratch_operands = 0 : i64, tpu.core_type = #tpu.core_type<tc>, window_params = [{transform_indices = @transform_0, window_bounds = array<i64: 8, 1408>}, {pipeline_mode = #tpu.pipeline_mode<synchronous>, transform_indices = @transform_1, window_bounds = array<i64: 1408, 128>}, {pipeline_mode = #tpu.pipeline_mode<synchronous>, transform_indices = @transform_2, window_bounds = array<i64: 1, 128>}, {transform_indices = @transform_3, window_bounds = array<i64: 8, 128>}]} {
    %c0 = arith.constant 0 : index
    %c0_0 = arith.constant 0 : index
    %0 = vector.load %arg1[%c0, %c0_0] : memref<8x1408xf32, #tpu.memory_space<vmem>>, vector<8x1408xf32>
    %c0_1 = arith.constant 0 : index
    %c0_2 = arith.constant 0 : index
    %1 = vector.load %arg2[%c0_1, %c0_2] : memref<1408x128xf32, #tpu.memory_space<vmem>>, vector<1408x128xf32>
    %cst = arith.constant dense<0.000000e+00> : vector<8x128xf32>
    %2 = tpu.matmul %0, %1, %cst {dimension_numbers = #tpu.dot_dimension_numbers<[1], [0], [0], [1], [0, 0, 1, 1], [], []>} : vector<8x1408xf32>, vector<1408x128xf32>, vector<8x128xf32> -> vector<8x128xf32>
    %c0_3 = arith.constant 0 : index
    %c0_4 = arith.constant 0 : index
    %3 = vector.load %arg3[%c0_3, %c0_4] : memref<1x128xf32, #tpu.memory_space<vmem>>, vector<1x128xf32>
    %4 = vector.broadcast %3 : vector<1x128xf32> to vector<8x128xf32>
    %5 = arith.addf %2, %4 : vector<8x128xf32>
    %c0_5 = arith.constant 0 : index
    %c0_6 = arith.constant 0 : index
    %6 = vector.load %arg4[%c0_5, %c0_6] : memref<8x128xf32, #tpu.memory_space<vmem>>, vector<8x128xf32>
    tpu.vector_store %arg4[%c0_5, %c0_6], %5 {strides = array<i32>} : memref<8x128xf32, #tpu.memory_space<vmem>>, vector<8x128xf32>,
    return
  }
  func.func @transform_0(%arg0: i32) -> (i32, i32) {
    %c0_i32 = arith.constant 0 : i32
    %c0_i32_0 = arith.constant 0 : i32
    return %arg0, %c0_i32 : i32, i32
  }
  func.func @transform_1(%arg0: i32) -> (i32, i32) {
    %c0_i32 = arith.constant 0 : i32
    %c0_i32_0 = arith.constant 0 : i32
    %c0_i32_1 = arith.constant 0 : i32
    return %c0_i32, %c0_i32_0 : i32, i32
  }
  func.func @transform_2(%arg0: i32) -> (i32, i32) {
    %c0_i32 = arith.constant 0 : i32
    %c0_i32_0 = arith.constant 0 : i32
    %c0_i32_1 = arith.constant 0 : i32
    return %c0_i32, %c0_i32_0 : i32, i32
  }
  func.func @transform_3(%arg0: i32) -> (i32, i32) {
    %c0_i32 = arith.constant 0 : i32
    %c0_i32_0 = arith.constant 0 : i32
    return %arg0, %c0_i32 : i32, i32
  }
}

</mosaic_0001>

<bundles_post_ra>
// kernel: tpu_custom_call.1
= control target key start
LH: loop header
LB: loop body
LE: loop exit
PB: predicated region body
PF: predicated region fallthrough
CT: control target
= control target key end

     0   :  { %8 = vsyncpa [#allocation3], 0  ;;  %s1246_s0 = inlined_call_operand.hbm [shape: f32[8,1408], index: 0, kind: input, shape index: {}]   ;;  %s1247_s1 = inlined_call_operand.hbm [shape: f32[1408,128], index: 1, kind: input, shape index: {}]   ;;  %s1248_s2 = inlined_call_operand.vmem [shape: f32[1,128], index: 2, kind: input, shape index: {}]   ;;  %s1249_s3 = inlined_call_operand.hbm [shape: f32[8,128], index: 3, kind: output, shape index: {}]  }
   0x1   :  { %9 = vsyncpa [#allocation6], 0 }
   0x2   :  { %10 = vsyncpa [#allocation4], 0  ;;  %s1164_s12 = smov [#allocation2]   ;;  %s1165_s14 = smov [#allocation5]  }
   0x3   :  { %s17_s13 = sshll.u32 %s1164_s12, 4  ;;  %s26_s15 = sshll.u32 %s1165_s14, 4  ;;  %s18_s13 = int_to_ptr.vmem [resolvable:$true] %s17_s13  ;;  %s1192_s15 = int_to_ptr.vmem [resolvable:$true] %s26_s15 }
   0x4   :  { %s1092_s18 = scalar_lea.hbm %s1246_s0, 1408 }
   0x5   :  { %p1093_p0 = scmp.ne.s32.totalorder %s1246_s0, %s1092_s18  ;;  %p1096_p1 = scmp.lt.u32.totalorder %s1092_s18, %s1246_s0 }
   0x7   :  { %p1098_p2 = pnand %p1096_p1, %p1093_p0 }
   0x9   :  { %1101 = shalt.err (!%p1098_p2)
}
   0xa   :  { %s1102_s23 = scalar_lea.vmem %s18_s13, 1408  ;;  %p1107_p4 = scmp.lt.s32.totalorder %s18_s13, %s18_s13 }
   0xb   :  { %p1103_p3 = scmp.ne.s32.totalorder %s18_s13, %s1102_s23  ;;  %p1108_p5 = scmp.lt.s32.totalorder %s1102_s23, %s1102_s23 }
   0xd   :  { %p1109_p6 = por %p1108_p5, %p1107_p4 }
   0xf   :  { %p1110_p7 = pnand %p1109_p6, %p1103_p3 }
  0x11   :  { %1113 = shalt.err (!%p1110_p7)
}
  0x12   :  { %20 = dma.hbm_to_vmem [thread:$0]  %s1246_s0, 1408, %s18_s13, [#allocation3]  }
  0x13   :  { %s1114_s28 = scalar_lea.hbm %s1247_s1, 22528 }
  0x14   :  { %p1115_p8 = scmp.ne.s32.totalorder %s1247_s1, %s1114_s28  ;;  %p1118_p9 = scmp.lt.u32.totalorder %s1114_s28, %s1247_s1 }
  0x16   :  { %p1120_p10 = pnand %p1118_p9, %p1115_p8 }
  0x18   :  { %1123 = shalt.err (!%p1120_p10)
}
  0x19   :  { %s1124_s6 = scalar_lea.vmem %s1192_s15, 22528  ;;  %p1129_p12 = scmp.lt.s32.totalorder %s1192_s15, %s1192_s15 }
  0x1a   :  { %p1125_p11 = scmp.ne.s32.totalorder %s1192_s15, %s1124_s6  ;;  %p1130_p13 = scmp.lt.s32.totalorder %s1124_s6, %s1124_s6 }
  0x1c   :  { %p1131_p0 = por %p1130_p13, %p1129_p12 }
  0x1e   :  { %p1132_p1 = pnand %p1131_p0, %p1125_p11 }
  0x20   :  { %1135 = shalt.err (!%p1132_p1)
}
  0x21   :  { %s1166_s0 = smov 128   ;;  %s1167_s7 = smov 8  }
  0x22   :  { %32 = dma.hbm_to_vmem [thread:$0]  %s1247_s1, 22528, %s1192_s15, [#allocation6], %s1166_s0, %s1166_s0, %s1167_s7  }
  0x23   :  { %1158 = dma.done.wait [#allocation3], 1408  }
  0x24   :  { %1159 = vsyncadd [#allocation3], 4294965888 }
  0x25   :  { %1160 = dma.done.wait [#allocation6], 22528  }
  0x26   :  { %1161 = vsyncadd [#allocation6], 4294944768  ;;  %v68_v0 = vld [vmem:[#allocation5 + $0x80] sm:$0xff]  ;;  %v69_v1 = vld [vmem:[#allocation5 + $0x88] sm:$0xff]  ;;  %vm1169_vm0 = vmmov 0  }
  0x27   :  { %v52_v2 = vld [vmem:[#allocation5] sm:$0xff]  ;;  %v900_v3 = vpack.c.bf16 %v69_v1, %v68_v0  ;;  %v53_v4 = vld [vmem:[#allocation5 + $0x8] sm:$0xff]  ;;  %v70_v11 = vld [vmem:[#allocation5 + $0x90] sm:$0xff] }
  0x28   :  { %v100_v5 = vld [vmem:[#allocation5 + $0x180] sm:$0xff]  ;;  %v101_v6 = vld [vmem:[#allocation5 + $0x188] sm:$0xff]  ;;  %v902_v7 = vpack.c.bf16 %v53_v4, %v52_v2  ;;  %v71_v13 = vld [vmem:[#allocation5 + $0x98] sm:$0xff] }
  0x29   :  { %v932_v8 = vpack.c.bf16 %v101_v6, %v100_v5  ;;  %v84_v9 = vld [vmem:[#allocation5 + $0x100] sm:$0xff]  ;;  %v85_v10 = vld [vmem:[#allocation5 + $0x108] sm:$0xff]  ;;  %901 = vmatprep.subr.bf16.mxu0 %v900_v3  ;;  %v54_v14 = vld [vmem:[#allocation5 + $0x10] sm:$0xff]  ;;  %v904_v16 = vpack.c.bf16 %v71_v13, %v70_v11 }
  0x2a   :  { %v934_v12 = vpack.c.bf16 %v85_v10, %v84_v9  ;;  %v55_v15 = vld [vmem:[#allocation5 + $0x18] sm:$0xff]  ;;  %903 = vmatpush3.bf16.msra.mxu0 %v902_v7  ;;  %v102_v18 = vld [vmem:[#allocation5 + $0x190] sm:$0xff]  ;;  %v72_v23 = vld [vmem:[#allocation5 + $0xa0] sm:$0xff] }
  0x2b   :  { %933 = vmatprep.subr.bf16.mxu1 %v932_v8  ;;  %v906_v17 = vpack.c.bf16 %v55_v15, %v54_v14  ;;  %v103_v19 = vld [vmem:[#allocation5 + $0x198] sm:$0xff]  ;;  %v86_v20 = vld [vmem:[#allocation5 + $0x110] sm:$0xff]  ;;  %v73_v24 = vld [vmem:[#allocation5 + $0xa8] sm:$0xff]  ;;  %905 = vmatprep.subr.bf16.mxu0 %v904_v16 }
  0x2c   :  { %935 = vmatpush3.bf16.msra.mxu1 %v934_v12  ;;  %v936_v21 = vpack.c.bf16 %v103_v19, %v102_v18  ;;  %v87_v22 = vld [vmem:[#allocation5 + $0x118] sm:$0xff]  ;;  %v908_v26 = vpack.c.bf16 %v73_v24, %v72_v23  ;;  %v56_v27 = vld [vmem:[#allocation5 + $0x20] sm:$0xff]  ;;  %v57_v28 = vld [vmem:[#allocation5 + $0x28] sm:$0xff] }
  0x2d   :  { %v938_v25 = vpack.c.bf16 %v87_v22, %v86_v20  ;;  %v104_v29 = vld [vmem:[#allocation5 + $0x1a0] sm:$0xff]  ;;  %v105_v30 = vld [vmem:[#allocation5 + $0x1a8] sm:$0xff]  ;;  %v910_v33 = vpack.c.bf16 %v57_v28, %v56_v27  ;;  %v74_v35 = vld [vmem:[#allocation5 + $0xb0] sm:$0xff] }
  0x2e   :  { %937 = vmatprep.subr.bf16.mxu1 %v936_v21  ;;  %v88_v31 = vld [vmem:[#allocation5 + $0x120] sm:$0xff]  ;;  %v89_v32 = vld [vmem:[#allocation5 + $0x128] sm:$0xff]  ;;  %907 = vmatpush3.bf16.msra.mxu0 %v906_v17  ;;  %v940_v34 = vpack.c.bf16 %v105_v30, %v104_v29  ;;  %v75_v36 = vld [vmem:[#allocation5 + $0xb8] sm:$0xff] }
  0x2f   :  { %v58_v37 = vld [vmem:[#allocation5 + $0x30] sm:$0xff]  ;;  %909 = vmatprep.subr.bf16.mxu0 %v908_v26  ;;  %v942_v38 = vpack.c.bf16 %v89_v32, %v88_v31  ;;  %v912_v39 = vpack.c.bf16 %v75_v36, %v74_v35  ;;  %v59_v40 = vld [vmem:[#allocation5 + $0x38] sm:$0xff]  ;;  %v76_v46 = vld [vmem:[#allocation5 + $0xc0] sm:$0xff] }
  0x30   :  { %939 = vmatpush3.bf16.msra.mxu1 %v938_v25  ;;  %v106_v41 = vld [vmem:[#allocation5 + $0x1b0] sm:$0xff]  ;;  %v107_v42 = vld [vmem:[#allocation5 + $0x1b8] sm:$0xff]  ;;  %v77_v47 = vld [vmem:[#allocation5 + $0xc8] sm:$0xff]  ;;  %v914_v48 = vpack.c.bf16 %v59_v40, %v58_v37 }
  0x31   :  { %941 = vmatprep.subr.bf16.mxu1 %v940_v34  ;;  %v944_v43 = vpack.c.bf16 %v107_v42, %v106_v41  ;;  %v90_v44 = vld [vmem:[#allocation5 + $0x130] sm:$0xff]  ;;  %v91_v45 = vld [vmem:[#allocation5 + $0x138] sm:$0xff]  ;;  %v108_v49 = vld [vmem:[#allocation5 + $0x1c0] sm:$0xff]  ;;  %v916_v52 = vpack.c.bf16 %v77_v47, %v76_v46 }
  0x32   :  { %911 = vmatpush3.bf16.msra.mxu0 %v910_v33  ;;  %v109_v50 = vld [vmem:[#allocation5 + $0x1c8] sm:$0xff]  ;;  %v946_v51 = vpack.c.bf16 %v91_v45, %v90_v44  ;;  %v60_v53 = vld [vmem:[#allocation5 + $0x40] sm:$0xff]  ;;  %v78_v58 = vld [vmem:[#allocation5 + $0xd0] sm:$0xff] }
  0x33   :  { %913 = vmatprep.subr.bf16.mxu0 %v912_v39  ;;  %v61_v54 = vld [vmem:[#allocation5 + $0x48] sm:$0xff]  ;;  %v92_v55 = vld [vmem:[#allocation5 + $0x140] sm:$0xff]  ;;  %v948_v56 = vpack.c.bf16 %v109_v50, %v108_v49  ;;  %v79_v59 = vld [vmem:[#allocation5 + $0xd8] sm:$0xff] }
  0x34   :  { %943 = vmatpush3.bf16.msra.mxu1 %v942_v38  ;;  %v93_v57 = vld [vmem:[#allocation5 + $0x148] sm:$0xff]  ;;  %v110_v60 = vld [vmem:[#allocation5 + $0x1d0] sm:$0xff]  ;;  %v111_v61 = vld [vmem:[#allocation5 + $0x1d8] sm:$0xff]  ;;  %v918_v62 = vpack.c.bf16 %v61_v54, %v60_v53  ;;  %v920_v0 = vpack.c.bf16 %v79_v59, %v78_v58 }
  0x35   :  { %945 = vmatprep.subr.bf16.mxu1 %v944_v43  ;;  %v950_v63 = vpack.c.bf16 %v93_v57, %v92_v55  ;;  %v62_v1 = vld [vmem:[#allocation5 + $0x50] sm:$0xff]  ;;  %v63_v2 = vld [vmem:[#allocation5 + $0x58] sm:$0xff]  ;;  %v952_v4 = vpack.c.bf16 %v111_v61, %v110_v60  ;;  %v80_v6 = vld [vmem:[#allocation5 + $0xe0] sm:$0xff] }
  0x36   :  { %915 = vmatpush3.bf16.msra.mxu0 %v914_v48  ;;  %v94_v3 = vld [vmem:[#allocation5 + $0x150] sm:$0xff]  ;;  %v95_v5 = vld [vmem:[#allocation5 + $0x158] sm:$0xff]  ;;  %v81_v7 = vld [vmem:[#allocation5 + $0xe8] sm:$0xff]  ;;  %v922_v10 = vpack.c.bf16 %v63_v2, %v62_v1 }
  0x37   :  { %917 = vmatprep.subr.bf16.mxu0 %v916_v52  ;;  %v112_v8 = vld [vmem:[#allocation5 + $0x1e0] sm:$0xff]  ;;  %v113_v9 = vld [vmem:[#allocation5 + $0x1e8] sm:$0xff]  ;;  %v42_v12 = vld [vmem:[#allocation2 + $0x8] sm:$0xff]  ;;  %v954_v13 = vpack.c.bf16 %v95_v5, %v94_v3  ;;  %v924_v14 = vpack.c.bf16 %v81_v7, %v80_v6 }
  0x38   :  { %947 = vmatpush3.bf16.msra.mxu1 %v946_v51  ;;  %v64_v11 = vld [vmem:[#allocation5 + $0x60] sm:$0xff]  ;;  %v65_v15 = vld [vmem:[#allocation5 + $0x68] sm:$0xff]  ;;  %v956_v18 = vpack.c.bf16 %v113_v9, %v112_v8  ;;  %v82_v19 = vld [vmem:[#allocation5 + $0xf0] sm:$0xff]  ;;  %299 = vmatprep.mubr.f32.mxu0 %v42_v12 }
  0x39   :  { %949 = vmatprep.subr.bf16.mxu1 %v948_v56  ;;  %v96_v16 = vld [vmem:[#allocation5 + $0x160] sm:$0xff]  ;;  %v97_v17 = vld [vmem:[#allocation5 + $0x168] sm:$0xff]  ;;  %v83_v20 = vld [vmem:[#allocation5 + $0xf8] sm:$0xff]  ;;  %v926_v24 = vpack.c.bf16 %v65_v15, %v64_v11 }
  0x3a   :  { %919 = vmatpush3.bf16.msra.mxu0 %v918_v62  ;;  %v44_v21 = vld [vmem:[#allocation2 + $0x18] sm:$0xff]  ;;  %v114_v22 = vld [vmem:[#allocation5 + $0x1f0] sm:$0xff]  ;;  %v115_v23 = vld [vmem:[#allocation5 + $0x1f8] sm:$0xff]  ;;  %v958_v25 = vpack.c.bf16 %v97_v17, %v96_v16  ;;  %v928_v26 = vpack.c.bf16 %v83_v20, %v82_v19 }
  0x3b   :  { %921 = vmatprep.subr.bf16.mxu0 %v920_v0  ;;  %369 = vmatprep.mubr.f32.mxu1 %v44_v21  ;;  %v66_v27 = vld [vmem:[#allocation5 + $0x70] sm:$0xff]  ;;  %v67_v28 = vld [vmem:[#allocation5 + $0x78] sm:$0xff]  ;;  %v960_v30 = vpack.c.bf16 %v115_v23, %v114_v22  ;;  %v132_v32 = vld [vmem:[#allocation5 + $0x280] sm:$0xff] }
  0x3c   :  { %951 = vmatpush3.bf16.msra.mxu1 %v950_v63  ;;  %v98_v29 = vld [vmem:[#allocation5 + $0x170] sm:$0xff]  ;;  %v99_v31 = vld [vmem:[#allocation5 + $0x178] sm:$0xff]  ;;  %v133_v33 = vld [vmem:[#allocation5 + $0x288] sm:$0xff]  ;;  %v930_v36 = vpack.c.bf16 %v67_v28, %v66_v27 }
  0x3d   :  { %953 = vmatprep.subr.bf16.mxu1 %v952_v4  ;;  %v164_v34 = vld [vmem:[#allocation5 + $0x380] sm:$0xff]  ;;  %v165_v35 = vld [vmem:[#allocation5 + $0x388] sm:$0xff]  ;;  %v962_v37 = vpack.c.bf16 %v99_v31, %v98_v29  ;;  %v964_v38 = vpack.c.bf16 %v133_v33, %v132_v32  ;;  %v134_v44 = vld [vmem:[#allocation5 + $0x290] sm:$0xff] }
  0x3e   :  { %923 = vmatpush3.bf16.msra.mxu0 %v922_v10  ;;  %v116_v39 = vld [vmem:[#allocation5 + $0x200] sm:$0xff]  ;;  %v117_v40 = vld [vmem:[#allocation5 + $0x208] sm:$0xff]  ;;  %v996_v42 = vpack.c.bf16 %v165_v35, %v164_v34  ;;  %v135_v45 = vld [vmem:[#allocation5 + $0x298] sm:$0xff] }
  0x3f   :  { %925 = vmatprep.subr.bf16.mxu0 %v924_v14  ;;  %v148_v41 = vld [vmem:[#allocation5 + $0x300] sm:$0xff]  ;;  %v149_v43 = vld [vmem:[#allocation5 + $0x308] sm:$0xff]  ;;  %v166_v46 = vld [vmem:[#allocation5 + $0x390] sm:$0xff]  ;;  %v966_v49 = vpack.c.bf16 %v117_v40, %v116_v39  ;;  %v968_v52 = vpack.c.bf16 %v135_v45, %v134_v44 }
  0x40   :  { %955 = vmatpush3.bf16.msra.mxu1 %v954_v13  ;;  %v167_v47 = vld [vmem:[#allocation5 + $0x398] sm:$0xff]  ;;  %v41_v48 = vld [vmem:[#allocation2] sm:$0xff]  ;;  %v998_v51 = vpack.c.bf16 %v149_v43, %v148_v41  ;;  %v118_v53 = vld [vmem:[#allocation5 + $0x210] sm:$0xff] }
  0x41   :  { %957 = vmatprep.subr.bf16.mxu1 %v956_v18  ;;  %v43_v50 = vld [vmem:[#allocation2 + $0x10] sm:$0xff]  ;;  %v150_v55 = vld [vmem:[#allocation5 + $0x310] sm:$0xff]  ;;  %v1000_v56 = vpack.c.bf16 %v167_v47, %v166_v46  ;;  %v136_v58 = vld [vmem:[#allocation5 + $0x2a0] sm:$0xff] }
  0x42   :  { %927 = vmatpush3.bf16.msra.mxu0 %v926_v24  ;;  %v119_v54 = vld [vmem:[#allocation5 + $0x218] sm:$0xff]  ;;  %v137_v59 = vld [vmem:[#allocation5 + $0x2a8] sm:$0xff]  ;;  %v168_v60 = vld [vmem:[#allocation5 + $0x3a0] sm:$0xff] }
  0x43   :  { %929 = vmatprep.subr.bf16.mxu0 %v928_v26  ;;  %v151_v57 = vld [vmem:[#allocation5 + $0x318] sm:$0xff]  ;;  %v169_v61 = vld [vmem:[#allocation5 + $0x3a8] sm:$0xff]  ;;  %v970_v62 = vpack.c.bf16 %v119_v54, %v118_v53  ;;  %v972_v0 = vpack.c.bf16 %v137_v59, %v136_v58  ;;  %v120_v1 = vld [vmem:[#allocation5 + $0x220] sm:$0xff] }
  0x44   :  { %959 = vmatpush3.bf16.msra.mxu1 %v958_v25  ;;  %v1002_v63 = vpack.c.bf16 %v151_v57, %v150_v55  ;;  %v121_v2 = vld [vmem:[#allocation5 + $0x228] sm:$0xff]  ;;  %v152_v3 = vld [vmem:[#allocation5 + $0x320] sm:$0xff]  ;;  %v1004_v4 = vpack.c.bf16 %v169_v61, %v168_v60  ;;  %v138_v6 = vld [vmem:[#allocation5 + $0x2b0] sm:$0xff] }
  0x45   :  { %961 = vmatprep.subr.bf16.mxu1 %v960_v30  ;;  %v153_v5 = vld [vmem:[#allocation5 + $0x328] sm:$0xff]  ;;  %v139_v7 = vld [vmem:[#allocation5 + $0x2b8] sm:$0xff]  ;;  %v170_v8 = vld [vmem:[#allocation5 + $0x3b0] sm:$0xff]  ;;  %v974_v10 = vpack.c.bf16 %v121_v2, %v120_v1 }
  0x46   :  { %931 = vmatpush3.bf16.msra.mxu0 %v930_v36  ;;  %v171_v9 = vld [vmem:[#allocation5 + $0x3b8] sm:$0xff]  ;;  %v1006_v11 = vpack.c.bf16 %v153_v5, %v152_v3  ;;  %v976_v12 = vpack.c.bf16 %v139_v7, %v138_v6  ;;  %v122_v13 = vld [vmem:[#allocation5 + $0x230] sm:$0xff]  ;;  %v140_v18 = vld [vmem:[#allocation5 + $0x2c0] sm:$0xff] }
  0x47   :  { %965 = vmatprep.subr.bf16.mxu0 %v964_v38  ;;  %v123_v14 = vld [vmem:[#allocation5 + $0x238] sm:$0xff]  ;;  %v154_v15 = vld [vmem:[#allocation5 + $0x330] sm:$0xff]  ;;  %v1008_v16 = vpack.c.bf16 %v171_v9, %v170_v8  ;;  %v141_v19 = vld [vmem:[#allocation5 + $0x2c8] sm:$0xff] }
  0x48   :  { %963 = vmatpush3.bf16.msra.mxu1 %v962_v37  ;;  %v155_v17 = vld [vmem:[#allocation5 + $0x338] sm:$0xff]  ;;  %v172_v20 = vld [vmem:[#allocation5 + $0x3c0] sm:$0xff]  ;;  %v173_v21 = vld [vmem:[#allocation5 + $0x3c8] sm:$0xff]  ;;  %v978_v23 = vpack.c.bf16 %v123_v14, %v122_v13  ;;  %v980_v26 = vpack.c.bf16 %v141_v19, %v140_v18 }
  0x49   :  { %997 = vmatprep.subr.bf16.mxu1 %v996_v42  ;;  %300 = vmatmul.mubr.f32.vlgmr.msra.gmra.mrb[0].mxu0 %v41_v48  ;;  %v46_v22 = vld [vmem:[#allocation2 + $0x28] sm:$0xff]  ;;  %v124_v24 = vld [vmem:[#allocation5 + $0x240] sm:$0xff]  ;;  %v1010_v25 = vpack.c.bf16 %v155_v17, %v154_v15  ;;  %v125_v27 = vld [vmem:[#allocation5 + $0x248] sm:$0xff]  ;;  %v1012_v30 = vpack.c.bf16 %v173_v21, %v172_v20 }
  0x4a   :  { %967 = vmatpush3.bf16.msra.mxu0 %v966_v49  ;;  %439 = vmatprep.mubr.f32.mxu0 %v46_v22  ;;  %v156_v28 = vld [vmem:[#allocation5 + $0x340] sm:$0xff]  ;;  %v157_v31 = vld [vmem:[#allocation5 + $0x348] sm:$0xff]  ;;  %v142_v32 = vld [vmem:[#allocation5 + $0x2d0] sm:$0xff]  ;;  %v982_v36 = vpack.c.bf16 %v125_v27, %v124_v24 }
  0x4b   :  { %370 = vmatmul.mubr.f32.vlgmr.msra.gmra.mrb[0].mxu1 %v43_v50  ;;  %969 = vmatprep.subr.bf16.mxu0 %v968_v52  ;;  %v48_v29 = vld [vmem:[#allocation2 + $0x38] sm:$0xff]  ;;  %v143_v33 = vld [vmem:[#allocation5 + $0x2d8] sm:$0xff]  ;;  %v174_v34 = vld [vmem:[#allocation5 + $0x3d0] sm:$0xff]  ;;  %v1014_v37 = vpack.c.bf16 %v157_v31, %v156_v28 }
  0x4c   :  { %999 = vmatpush3.bf16.msra.mxu1 %v998_v51  ;;  %509 = vmatprep.mubr.f32.mxu1 %v48_v29  ;;  %v175_v35 = vld [vmem:[#allocation5 + $0x3d8] sm:$0xff]  ;;  %v984_v38 = vpack.c.bf16 %v143_v33, %v142_v32  ;;  %v126_v39 = vld [vmem:[#allocation5 + $0x250] sm:$0xff]  ;;  %v144_v44 = vld [vmem:[#allocation5 + $0x2e0] sm:$0xff] }
  0x4d   :  { %1001 = vmatprep.subr.bf16.mxu1 %v1000_v56  ;;  %v127_v40 = vld [vmem:[#allocation5 + $0x258] sm:$0xff]  ;;  %v158_v41 = vld [vmem:[#allocation5 + $0x350] sm:$0xff]  ;;  %v1016_v42 = vpack.c.bf16 %v175_v35, %v174_v34  ;;  %v145_v45 = vld [vmem:[#allocation5 + $0x2e8] sm:$0xff] }
  0x4e   :  { %971 = vmatpush3.bf16.msra.mxu0 %v970_v62  ;;  %v159_v43 = vld [vmem:[#allocation5 + $0x358] sm:$0xff]  ;;  %v176_v46 = vld [vmem:[#allocation5 + $0x3e0] sm:$0xff]  ;;  %v177_v47 = vld [vmem:[#allocation5 + $0x3e8] sm:$0xff]  ;;  %v986_v48 = vpack.c.bf16 %v127_v40, %v126_v39  ;;  %v988_v50 = vpack.c.bf16 %v145_v45, %v144_v44 }
  0x4f   :  { %973 = vmatprep.subr.bf16.mxu0 %v972_v0  ;;  %v1018_v49 = vpack.c.bf16 %v159_v43, %v158_v41  ;;  %v128_v51 = vld [vmem:[#allocation5 + $0x260] sm:$0xff]  ;;  %v129_v52 = vld [vmem:[#allocation5 + $0x268] sm:$0xff]  ;;  %v1020_v54 = vpack.c.bf16 %v177_v47, %v176_v46  ;;  %v146_v56 = vld [vmem:[#allocation5 + $0x2f0] sm:$0xff] }
  0x50   :  { %1003 = vmatpush3.bf16.msra.mxu1 %v1002_v63  ;;  %v160_v53 = vld [vmem:[#allocation5 + $0x360] sm:$0xff]  ;;  %v161_v55 = vld [vmem:[#allocation5 + $0x368] sm:$0xff]  ;;  %v147_v57 = vld [vmem:[#allocation5 + $0x2f8] sm:$0xff]  ;;  %v990_v60 = vpack.c.bf16 %v129_v52, %v128_v51 }
  0x51   :  { %1005 = vmatprep.subr.bf16.mxu1 %v1004_v4  ;;  %v178_v58 = vld [vmem:[#allocation5 + $0x3f0] sm:$0xff]  ;;  %v179_v59 = vld [vmem:[#allocation5 + $0x3f8] sm:$0xff]  ;;  %v1022_v61 = vpack.c.bf16 %v161_v55, %v160_v53  ;;  %v992_v62 = vpack.c.bf16 %v147_v57, %v146_v56  ;;  %v196_v4 = vld [vmem:[#allocation5 + $0x480] sm:$0xff] }
  0x52   :  { %975 = vmatpush3.bf16.msra.mxu0 %v974_v10  ;;  %v130_v63 = vld [vmem:[#allocation5 + $0x270] sm:$0xff]  ;;  %v131_v0 = vld [vmem:[#allocation5 + $0x278] sm:$0xff]  ;;  %v1024_v2 = vpack.c.bf16 %v179_v59, %v178_v58  ;;  %v197_v5 = vld [vmem:[#allocation5 + $0x488] sm:$0xff] }
  0x53   :  { %977 = vmatprep.subr.bf16.mxu0 %v976_v12  ;;  %v162_v1 = vld [vmem:[#allocation5 + $0x370] sm:$0xff]  ;;  %v163_v3 = vld [vmem:[#allocation5 + $0x378] sm:$0xff]  ;;  %v994_v6 = vpack.c.bf16 %v131_v0, %v130_v63  ;;  %v1028_v8 = vpack.c.bf16 %v197_v5, %v196_v4  ;;  %v180_v9 = vld [vmem:[#allocation5 + $0x400] sm:$0xff] }
  0x54   :  { %1007 = vmatpush3.bf16.msra.mxu1 %v1006_v11  ;;  %v1026_v7 = vpack.c.bf16 %v163_v3, %v162_v1  ;;  %v181_v10 = vld [vmem:[#allocation5 + $0x408] sm:$0xff]  ;;  %v198_v11 = vld [vmem:[#allocation5 + $0x490] sm:$0xff]  ;;  %v199_v12 = vld [vmem:[#allocation5 + $0x498] sm:$0xff] }
  0x55   :  { %1009 = vmatprep.subr.bf16.mxu1 %v1008_v16  ;;  %v212_v13 = vld [vmem:[#allocation5 + $0x500] sm:$0xff]  ;;  %v213_v14 = vld [vmem:[#allocation5 + $0x508] sm:$0xff]  ;;  %v1030_v16 = vpack.c.bf16 %v181_v10, %v180_v9  ;;  %v47_v17 = vld [vmem:[#allocation2 + $0x30] sm:$0xff]  ;;  %v1032_v18 = vpack.c.bf16 %v199_v12, %v198_v11 }
  0x56   :  { %979 = vmatpush3.bf16.msra.mxu0 %v978_v23  ;;  %v45_v15 = vld [vmem:[#allocation2 + $0x20] sm:$0xff]  ;;  %v182_v19 = vld [vmem:[#allocation5 + $0x410] sm:$0xff]  ;;  %v183_v20 = vld [vmem:[#allocation5 + $0x418] sm:$0xff]  ;;  %v1061_v21 = vpack.c.bf16 %v213_v14, %v212_v13  ;;  %v1168_v23 = vmov 0.0|0.0  }
  0x57   :  { %981 = vmatprep.subr.bf16.mxu0 %v980_v26  ;;  %v200_v22 = vld [vmem:[#allocation5 + $0x4a0] sm:$0xff]  ;;  %v201_v24 = vld [vmem:[#allocation5 + $0x4a8] sm:$0xff]  ;;  %v215_v26 = vld [vmem:[#allocation5 + $0x518] sm:$0xff]  ;;  %v1034_v28 = vpack.c.bf16 %v183_v20, %v182_v19 }
  0x58   :  { %1011 = vmatpush3.bf16.msra.mxu1 %v1010_v25  ;;  %v214_v25 = vld [vmem:[#allocation5 + $0x510] sm:$0xff]  ;;  %v1036_v29 = vpack.c.bf16 %v201_v24, %v200_v22  ;;  %v185_v31 = vld [vmem:[#allocation5 + $0x428] sm:$0xff]  ;;  %v203_v34 = vld [vmem:[#allocation5 + $0x4b8] sm:$0xff] }
  0x59   :  { %1013 = vmatprep.subr.bf16.mxu1 %v1012_v30  ;;  %v50_v27 = vld [vmem:[#allocation2 + $0x48] sm:$0xff]  ;;  %v184_v30 = vld [vmem:[#allocation5 + $0x420] sm:$0xff]  ;;  %v1064_v32 = vpack.c.bf16 %v215_v26, %v214_v25  ;;  %v187_v41 = vld [vmem:[#allocation5 + $0x438] sm:$0xff] }
  0x5a   :  { %983 = vmatpush3.bf16.msra.mxu0 %v982_v36  ;;  %v202_v33 = vld [vmem:[#allocation5 + $0x4b0] sm:$0xff]  ;;  %v216_v35 = vld [vmem:[#allocation5 + $0x520] sm:$0xff]  ;;  %v217_v36 = vld [vmem:[#allocation5 + $0x528] sm:$0xff] }
  0x5b   :  { %985 = vmatprep.subr.bf16.mxu0 %v984_v38  ;;  %v1038_v38 = vpack.c.bf16 %v185_v31, %v184_v30  ;;  %v1040_v39 = vpack.c.bf16 %v203_v34, %v202_v33  ;;  %v186_v40 = vld [vmem:[#allocation5 + $0x430] sm:$0xff]  ;;  %v204_v43 = vld [vmem:[#allocation5 + $0x4c0] sm:$0xff]  ;;  %v205_v44 = vld [vmem:[#allocation5 + $0x4c8] sm:$0xff] }
  0x5c   :  { %1015 = vmatpush3.bf16.msra.mxu1 %v1014_v37  ;;  %v1170_v37 = vmov 0.0   ;;  %v218_v45 = vld [vmem:[#allocation5 + $0x530] sm:$0xff]  ;;  %v219_v46 = vld [vmem:[#allocation5 + $0x538] sm:$0xff]  ;;  %v1042_v47 = vpack.c.bf16 %v187_v41, %v186_v40  ;;  %v221_v55 = vld [vmem:[#allocation5 + $0x548] sm:$0xff] }
  0x5d   :  { %1017 = vmatprep.subr.bf16.mxu1 %v1016_v42  ;;  %v1067_v42 = vpack.c.bf16 %v217_v36, %v216_v35  ;;  %v1070_v51 = vpack.c.bf16 %v219_v46, %v218_v45  ;;  %v206_v52 = vld [vmem:[#allocation5 + $0x4d0] sm:$0xff]  ;;  %v207_v53 = vld [vmem:[#allocation5 + $0x4d8] sm:$0xff]  ;;  %v192_v3 = vld [vmem:[#allocation5 + $0x460] sm:$0xff] }
  0x5e   :  { %987 = vmatpush3.bf16.msra.mxu0 %v986_v48  ;;  %v1044_v48 = vpack.c.bf16 %v205_v44, %v204_v43  ;;  %v1048_v57 = vpack.c.bf16 %v207_v53, %v206_v52  ;;  %v190_v58 = vld [vmem:[#allocation5 + $0x450] sm:$0xff]  ;;  %v191_v59 = vld [vmem:[#allocation5 + $0x458] sm:$0xff]  ;;  %v193_v4 = vld [vmem:[#allocation5 + $0x468] sm:$0xff] }
  0x5f   :  { %989 = vmatprep.subr.bf16.mxu0 %v988_v50  ;;  %v189_v50 = vld [vmem:[#allocation5 + $0x448] sm:$0xff]  ;;  %v222_v63 = vld [vmem:[#allocation5 + $0x550] sm:$0xff]  ;;  %v223_v0 = vld [vmem:[#allocation5 + $0x558] sm:$0xff]  ;;  %v1050_v1 = vpack.c.bf16 %v191_v59, %v190_v58  ;;  %v1054_v10 = vpack.c.bf16 %v193_v4, %v192_v3 }
  0x60   :  { %1019 = vmatpush3.bf16.msra.mxu1 %v1018_v49  ;;  %v188_v49 = vld [vmem:[#allocation5 + $0x440] sm:$0xff]  ;;  %v1076_v5 = vpack.c.bf16 %v223_v0, %v222_v63  ;;  %v225_v9 = vld [vmem:[#allocation5 + $0x568] sm:$0xff]  ;;  %v194_v12 = vld [vmem:[#allocation5 + $0x470] sm:$0xff] }
  0x61   :  { %1021 = vmatprep.subr.bf16.mxu1 %v1020_v54  ;;  %v220_v54 = vld [vmem:[#allocation5 + $0x540] sm:$0xff]  ;;  %v1046_v56 = vpack.c.bf16 %v189_v50, %v188_v49  ;;  %v195_v13 = vld [vmem:[#allocation5 + $0x478] sm:$0xff]  ;;  %v49_v19 = vld [vmem:[#allocation2 + $0x40] sm:$0xff] }
  0x62   :  { %991 = vmatpush3.bf16.msra.mxu0 %v990_v60  ;;  %v1073_v60 = vpack.c.bf16 %v221_v55, %v220_v54  ;;  %v51_v20 = vld [vmem:[#allocation2 + $0x50] sm:$0xff]  ;;  %v672_v22 = vld [vmem:[%s1248_s2] ss:$0 sm:$0xff]  ;;  %s1171_s2 = smov [#allocation7]  }
  0x63   :  { %993 = vmatprep.subr.bf16.mxu0 %v992_v62  ;;  %v209_v62 = vld [vmem:[#allocation5 + $0x4e8] sm:$0xff]  ;;  %s662_s11 = sshll.u32 %s1171_s2, 4  ;;  %s663_s11 = int_to_ptr.vmem [resolvable:$true] %s662_s11 }
  0x64   :  { %1023 = vmatpush3.bf16.msra.mxu1 %v1022_v61  ;;  %v208_v61 = vld [vmem:[#allocation5 + $0x4e0] sm:$0xff]  ;;  %s1136_s12 = scalar_lea.vmem %s663_s11, 128  ;;  %p1141_p3 = scmp.lt.s32.totalorder %s663_s11, %s663_s11 }
  0x65   :  { %1025 = vmatprep.subr.bf16.mxu1 %v1024_v2  ;;  %v1052_v2 = vpack.c.bf16 %v209_v62, %v208_v61  ;;  %p1137_p2 = scmp.ne.s32.totalorder %s663_s11, %s1136_s12  ;;  %p1142_p4 = scmp.lt.s32.totalorder %s1136_s12, %s1136_s12 }
  0x66   :  { %995 = vmatpush3.bf16.msra.mxu0 %v994_v6  ;;  %v210_v6 = vld [vmem:[#allocation5 + $0x4f0] sm:$0xff] }
  0x67   :  { %1029 = vmatprep.subr.bf16.mxu0 %v1028_v8  ;;  %v224_v8 = vld [vmem:[#allocation5 + $0x560] sm:$0xff]  ;;  %p1143_p5 = por %p1142_p4, %p1141_p3 }
  0x68   :  { %1027 = vmatpush3.bf16.msra.mxu1 %v1026_v7  ;;  %v211_v7 = vld [vmem:[#allocation5 + $0x4f8] sm:$0xff]  ;;  %v1079_v14 = vpack.c.bf16 %v225_v9, %v224_v8 }
  0x69   :  { %1060 = vmatprep.subr.bf16.mxu1 %v1168_v23  ;;  %440 = vmatmul.mubr.f32.vlgmr.msra.gmra.mrb[2].mxu0 %v45_v15  ;;  %v1056_v11 = vpack.c.bf16 %v211_v7, %v210_v6  ;;  %v226_v15 = vld [vmem:[#allocation5 + $0x570] sm:$0xff]  ;;  %p1144_p6 = pnand %p1143_p5, %p1137_p2 }
  0x6a   :  { %1031 = vmatpush3.bf16.msra.mxu0 %v1030_v16  ;;  %579 = vmatprep.mubr.f32.mxu0 %v50_v27  ;;  %v227_v16 = vld [vmem:[#allocation5 + $0x578] sm:$0xff] }
  0x6b   :  { %510 = vmatmul.mubr.f32.vlgmr.msra.gmra.mrb[2].mxu1 %v47_v17  ;;  %1033 = vmatprep.subr.bf16.mxu0 %v1032_v18  ;;  %v1058_v17 = vpack.c.bf16 %v195_v13, %v194_v12  ;;  %v1082_v18 = vpack.c.bf16 %v227_v16, %v226_v15 }
  0x6c   :  { %1062 = vmatpush3.bf16.msra.mxu1 %v1061_v21  ;;  %897 = vmatprep.mubr.msk.f32.mxu1 %vm1169_vm0, %v1170_v37 }
  0x6d   :  { %1063 = vmatprep.subr.bf16.mxu1 %v1168_v23 }
  0x6e   :  { %1035 = vmatpush3.bf16.msra.mxu0 %v1034_v28 }
  0x6f   :  { %1037 = vmatprep.subr.bf16.mxu0 %v1036_v29 }
  0x70   :  { %1065 = vmatpush3.bf16.msra.mxu1 %v1064_v32 }
  0x71   :  { %1066 = vmatprep.subr.bf16.mxu1 %v1168_v23 }
  0x72   :  { %1039 = vmatpush3.bf16.msra.mxu0 %v1038_v38 }
  0x73   :  { %1041 = vmatprep.subr.bf16.mxu0 %v1040_v39 }
  0x74   :  { %1068 = vmatpush3.bf16.msra.mxu1 %v1067_v42 }
  0x75   :  { %1069 = vmatprep.subr.bf16.mxu1 %v1168_v23 }
  0x76   :  { %1043 = vmatpush3.bf16.msra.mxu0 %v1042_v47 }
  0x77   :  { %1045 = vmatprep.subr.bf16.mxu0 %v1044_v48 }
  0x78   :  { %1071 = vmatpush3.bf16.msra.mxu1 %v1070_v51 }
  0x79   :  { %1072 = vmatprep.subr.bf16.mxu1 %v1168_v23 }
  0x7a   :  { %1047 = vmatpush3.bf16.msra.mxu0 %v1046_v56 }
  0x7b   :  { %1049 = vmatprep.subr.bf16.mxu0 %v1048_v57 }
  0x7c   :  { %1074 = vmatpush3.bf16.msra.mxu1 %v1073_v60 }
  0x7d   :  { %1075 = vmatprep.subr.bf16.mxu1 %v1168_v23 }
  0x7e   :  { %1051 = vmatpush3.bf16.msra.mxu0 %v1050_v1 }
  0x7f   :  { %1053 = vmatprep.subr.bf16.mxu0 %v1052_v2 }
  0x80   :  { %1077 = vmatpush3.bf16.msra.mxu1 %v1076_v5 }
  0x81   :  { %1078 = vmatprep.subr.bf16.mxu1 %v1168_v23 }
  0x82   :  { %1055 = vmatpush3.bf16.msra.mxu0 %v1054_v10 }
  0x83   :  { %1057 = vmatprep.subr.bf16.mxu0 %v1056_v11 }
  0x84   :  { %1080 = vmatpush3.bf16.msra.mxu1 %v1079_v14 }
  0x85   :  { %1081 = vmatprep.subr.bf16.mxu1 %v1168_v23 }
  0x86   :  { %1059 = vmatpush3.bf16.msra.mxu0 %v1058_v17 }
  0x88   :  { %1083 = vmatpush3.bf16.msra.mxu1 %v1082_v18 }
  0x89   :  { %580 = vmatmul.mubr.f32.vlgmr.msra.gmra.mrb[4].mxu0 %v49_v19 }
  0x8b   :  { %898 = vmatmul.mubr.f32.vlgmr.msra.gmra.mrb[4].mxu1 %v51_v20 }
 0x11c   :  { %v705_v21 = vpop.f32.mrb[0].mxu0 }
 0x11d   :  { %v706_v24 = vpop.f32.mrb[1].mxu0 }
 0x11e   :  { %v740_v25 = vpop.f32.mrb[0].mxu1  ;;  %v707_v26 = vadd.f32 %v706_v24, %v705_v21 }
 0x11f   :  { %v741_v27 = vpop.f32.mrb[1].mxu1 }
 0x120   :  { %v742_v28 = vadd.f32 %v741_v27, %v740_v25  ;;  %v302_v29 = vadd.f32 %v707_v26, %v672_v22 }
 0x122   :  { %v372_v30 = vadd.f32 %v742_v28, %v302_v29 }
 0x13c   :  { %v775_v31 = vpop.f32.mrb[2].mxu0 }
 0x13d   :  { %v776_v23 = vpop.f32.mrb[3].mxu0 }
 0x13e   :  { %v810_v32 = vpop.f32.mrb[2].mxu1  ;;  %v777_v33 = vadd.f32 %v776_v23, %v775_v31 }
 0x13f   :  { %v811_v34 = vpop.f32.mrb[3].mxu1 }
 0x140   :  { %v812_v35 = vadd.f32 %v811_v34, %v810_v32  ;;  %v442_v36 = vadd.f32 %v777_v33, %v372_v30 }
 0x142   :  { %v512_v37 = vadd.f32 %v812_v35, %v442_v36 }
 0x15c   :  { %v845_v38 = vpop.f32.mrb[4].mxu0 }
 0x15d   :  { %v846_v39 = vpop.f32.mrb[5].mxu0 }
 0x15e   :  { %v651_v40 = vpop.f32.mrb[4].mxu1  ;;  %v847_v41 = vadd.f32 %v846_v39, %v845_v38 }
 0x15f   :  { %v899_v42 = vpop.f32.mrb[5].mxu1 }
 0x160   :  { %v582_v43 = vadd.f32 %v847_v41, %v512_v37 }
 0x162   :  { %v652_v44 = vadd.f32 %v651_v40, %v582_v43 }
 0x164   :  { %655 = vst [vmem:[#allocation7] sm:$0xff] %v652_v44 }
 0x165   :  { %1147 = shalt.err (!%p1144_p6)
}
 0x166   :  { %s1148_s15 = scalar_lea.hbm %s1249_s3, 128 }
 0x167   :  { %p1149_p7 = scmp.ne.s32.totalorder %s1249_s3, %s1148_s15  ;;  %p1152_p8 = scmp.lt.u32.totalorder %s1148_s15, %s1249_s3 }
 0x169   :  { %p1154_p9 = pnand %p1152_p8, %p1149_p7 }
 0x16b   :  { %1157 = shalt.err (!%p1154_p9)
}
 0x16c   :  { %665 = dma.vmem_to_hbm [thread:$0]  %s663_s11, 128, %s1249_s3, [#allocation4]  }
 0x16d   :  { %1162 = dma.done.wait [#allocation4], 128  }
 0x16e   :  { %1163 = vsyncadd [#allocation4], 4294967168 }
 0x16f   :  { %669 = vsyncpa [#allocation3], 1 }
 0x170   :  { %670 = vsyncpa [#allocation6], 1 }
 0x171   :  { %671 = vsyncpa [#allocation4], 1 }

</bundles_post_ra>
